<compile_context>
chip_gen: v7x
topology: tpu7x:2x2x1
jax: 0.10.0
libtpu: 0.0.40
codegen_flags: <defaults>
</compile_context>

<pallas_src>
import functools
from typing import NamedTuple

import jax
import jax.numpy as jnp
from jax.experimental import pallas as pl
from jax.experimental.pallas import tpu as pltpu

LANE = 128
SUBLANE = 8


def _round_up(n: int, m: int) -> int:
    return ((n + m - 1) // m) * m


def _cdiv(a: int, b: int) -> int:
    return -(-a // b)


def _pick_hw_config():
    """(vmem_limit_bytes, default block_b) tuned per TPU generation."""
    try:
        kind = jax.devices()[0].device_kind.lower()
    except Exception:
        kind = ""
    if any(tag in kind for tag in ("v4", "v5", "v6")):
        # 128 MiB physical VMEM: larger tiles amortize the ~0.35 us/step overhead.
        return 100 * 1024 * 1024, 1024
    # v7x (64 MiB physical VMEM) / unknown: conservative.
    return 48 * 1024 * 1024, 512


_VMEM_LIMIT, _DEFAULT_BLOCK_B = _pick_hw_config()
_BUFFERED_OK = hasattr(pl, "Buffered")


class MLPParams(NamedTuple):
    w1: jax.Array   # (d_in_p, h_p)    compute dtype (bf16 by default)
    b1: jax.Array   # (1, h_p)         f32
    w2: jax.Array   # (h_p, d_out_p)   compute dtype
    b2: jax.Array   # (1, d_out_p)     f32
    d_out: int      # original output dim (static)
    block_h: int    # hidden-dim tile (static, multiple of 128)


def prepare_mlp_params(w1, b1, w2, b2, *, param_dtype=jnp.bfloat16,
                       block_h=None, vmem_limit_bytes=None):
    """Pad + cast the MLP parameters once (hoisted out of the per-call path).

    w1: (D_in, H), b1: (H,) or (1,H), w2: (H, D_out), b2: (D_out,) or (1,D_out).
    Zero padding is mathematically exact: padded hidden columns give
    sigmoid(0)=0.5, but the matching zero rows of w2 kill their contribution.
    """
    D_in, H = w1.shape
    D_out = w2.shape[1]
    d_in_p = max(_round_up(D_in, LANE), LANE)
    h_p = max(_round_up(H, LANE), LANE)
    d_out_p = max(_round_up(D_out, LANE), LANE)

    vmem = int(vmem_limit_bytes or _VMEM_LIMIT)
    itemsize = jnp.dtype(param_dtype).itemsize
    if block_h is None:
        w_bytes = itemsize * (d_in_p * h_p + h_p * d_out_p)
        budget = max(vmem // 3, 1)  # leave room for activations / acc / buffering
        if w_bytes > budget:
            n_h = _cdiv(w_bytes, budget)
            block_h = max(LANE, _round_up(_cdiv(h_p, n_h), LANE))
        else:
            block_h = h_p
    block_h = max(LANE, _round_up(min(int(block_h), h_p), LANE))
    h_p = _round_up(h_p, block_h)  # hidden grid divides evenly

    f32 = jnp.float32
    w1_p = jnp.zeros((d_in_p, h_p), param_dtype).at[:D_in, :H].set(
        w1.astype(param_dtype))
    b1_p = jnp.zeros((1, h_p), f32).at[:, :H].set(
        jnp.reshape(b1, (1, H)).astype(f32))
    w2_p = jnp.zeros((h_p, d_out_p), param_dtype).at[:H, :D_out].set(
        w2.astype(param_dtype))
    b2_p = jnp.zeros((1, d_out_p), f32).at[:, :D_out].set(
        jnp.reshape(b2, (1, D_out)).astype(f32))
    return MLPParams(w1=w1_p, b1=b1_p, w2=w2_p, b2=b2_p,
                     d_out=int(D_out), block_h=int(block_h))


def _mlp_kernel(x_ref, w1_ref, b1_ref, w2_ref, b2_ref, o_ref):
    # Low-precision (bf16 by default) MXU feeds, f32 accumulation.
    h = jnp.dot(x_ref[...], w1_ref[...], preferred_element_type=jnp.float32)
    # Bias + sigmoid in f32 (portable across v5e/v6e/v7x; exp runs on the EUP).
    h = jax.nn.sigmoid(h + b1_ref[...])
    y = jnp.dot(h.astype(w2_ref.dtype), w2_ref[...],
                preferred_element_type=jnp.float32)
    o_ref[...] = (y + b2_ref[...]).astype(o_ref.dtype)


def _mlp_kernel_htiled(x_ref, w1_ref, b1_ref, w2_ref, b2_ref, o_ref, acc_ref):
    # Hidden-dim tiled variant: grid = (batch_tiles, hidden_tiles), hidden last.
    k = pl.program_id(1)

    @pl.when(k == 0)
    def _():
        acc_ref[...] = jnp.zeros_like(acc_ref)

    h = jnp.dot(x_ref[...], w1_ref[...], preferred_element_type=jnp.float32)
    h = jax.nn.sigmoid(h + b1_ref[...])
    acc_ref[...] += jnp.dot(h.astype(w2_ref.dtype), w2_ref[...],
                            preferred_element_type=jnp.float32)

    @pl.when(k == pl.num_programs(1) - 1)
    def _():
        o_ref[...] = (acc_ref[...] + b2_ref[...]).astype(o_ref.dtype)


def _block_spec(shape, index_map, *, single_buffer=False):
    if single_buffer and _BUFFERED_OK:
        # Constant index_map -> never refetched; one buffer halves resident VMEM.
        return pl.BlockSpec(shape, index_map, pipeline_mode=pl.Buffered(1))
    return pl.BlockSpec(shape, index_map)


def _batch_tiling(batch, block_b):
    b8 = max(_round_up(batch, SUBLANE), SUBLANE)
    tm_cap = max(SUBLANE, (block_b // SUBLANE) * SUBLANE)  # tm always multiple of 8
    tm_cap = min(tm_cap, b8)
    n_b = _cdiv(b8, tm_cap)
    if n_b == 1 and b8 >= 512:
        # Give the pipeline (and v7x's 2 TensorCores) at least two batch steps.
        n_b = 2
    tm = _round_up(_cdiv(b8, n_b), SUBLANE)  # balanced: last tile isn't mostly padding
    return tm, n_b, tm * n_b


@functools.partial(
    jax.jit,
    static_argnames=("d_out", "block_h", "block_b", "out_dtype", "single_buffer"))
def _mlp_forward_impl(x, w1_p, b1_p, w2_p, b2_p, *, d_out, block_h, block_b,
                      out_dtype, single_buffer):
    B, D_in = x.shape
    d_in_p, h_p = w1_p.shape
    d_out_p = w2_p.shape[1]
    n_h = h_p // block_h
    tm, n_b, b_p = _batch_tiling(B, block_b)

    # Cast (and pad only if actually needed) the activations to the compute dtype.
    x_in = x.astype(w1_p.dtype)
    if (b_p, d_in_p) != (B, D_in):
        x_in = jnp.zeros((b_p, d_in_p), w1_p.dtype).at[:B, :D_in].set(x_in)

    out_shape = jax.ShapeDtypeStruct((b_p, d_out_p), out_dtype)

    if n_b == 1 and n_h == 1:
        # Single tile: whole arrays resident in VMEM, no grid machinery at all.
        out = pl.pallas_call(
            _mlp_kernel,
            out_shape=out_shape,
            in_specs=[pl.BlockSpec(memory_space=pltpu.MemorySpace.VMEM)] * 5,
            out_specs=pl.BlockSpec(memory_space=pltpu.MemorySpace.VMEM),
            compiler_params=pltpu.CompilerParams(vmem_limit_bytes=_VMEM_LIMIT),
        )(x_in, w1_p, b1_p, w2_p, b2_p)
    elif n_h == 1:
        # Batch-tiled: weights/biases VMEM-resident (constant index_map, single
        # buffered when supported); activations double-buffered over the batch.
        out = pl.pallas_call(
            _mlp_kernel,
            out_shape=out_shape,
            grid=(n_b,),
            in_specs=[
                pl.BlockSpec((tm, d_in_p), lambda i: (i, 0)),
                _block_spec((d_in_p, h_p), lambda i: (0, 0),
                            single_buffer=single_buffer),
                _block_spec((1, h_p), lambda i: (0, 0),
                            single_buffer=single_buffer),
                _block_spec((h_p, d_out_p), lambda i: (0, 0),
                            single_buffer=single_buffer),
                _block_spec((1, d_out_p), lambda i: (0, 0),
                            single_buffer=single_buffer),
            ],
            out_specs=pl.BlockSpec((tm, d_out_p), lambda i: (i, 0)),
            compiler_params=pltpu.CompilerParams(
                dimension_semantics=("parallel",),
                vmem_limit_bytes=_VMEM_LIMIT),
        )(x_in, w1_p, b1_p, w2_p, b2_p)
    else:
        # Large hidden dim: stream hidden tiles of w1/w2, accumulate the second
        # matmul in an f32 scratch; reduction (hidden) axis is last + "arbitrary".
        out = pl.pallas_call(
            _mlp_kernel_htiled,
            out_shape=out_shape,
            grid=(n_b, n_h),
            in_specs=[
                pl.BlockSpec((tm, d_in_p), lambda i, k: (i, 0)),
                pl.BlockSpec((d_in_p, block_h), lambda i, k: (0, k)),
                pl.BlockSpec((1, block_h), lambda i, k: (0, k)),
                pl.BlockSpec((block_h, d_out_p), lambda i, k: (k, 0)),
                _block_spec((1, d_out_p), lambda i, k: (0, 0),
                            single_buffer=single_buffer),
            ],
            out_specs=pl.BlockSpec((tm, d_out_p), lambda i, k: (i, 0)),
            scratch_shapes=[pltpu.VMEM((tm, d_out_p), jnp.float32)],
            compiler_params=pltpu.CompilerParams(
                dimension_semantics=("parallel", "arbitrary"),
                vmem_limit_bytes=_VMEM_LIMIT),
        )(x_in, w1_p, b1_p, w2_p, b2_p)

    if (b_p, d_out_p) != (B, d_out):
        out = out[:B, :d_out]
    return out


def mlp_forward_padded(x, params: MLPParams, *, block_b=None,
                       out_dtype=jnp.float32):
    """y = sigmoid(x @ W1 + b1) @ W2 + b2, params pre-padded by prepare_mlp_params."""
    global _BUFFERED_OK
    if block_b is None:
        block_b = _DEFAULT_BLOCK_B
    args = (x, params.w1, params.b1, params.w2, params.b2)
    kw = dict(d_out=params.d_out, block_h=params.block_h, block_b=int(block_b),
              out_dtype=out_dtype)
    if _BUFFERED_OK:
        try:
            return _mlp_forward_impl(*args, single_buffer=True, **kw)
        except Exception:
            # pl.Buffered(1) not accepted by this jax/Mosaic version -> plain specs.
            _BUFFERED_OK = False
    return _mlp_forward_impl(*args, single_buffer=False, **kw)


def mlp_forward(x, w1, b1, w2, b2, *, block_b=None, out_dtype=jnp.float32,
                param_dtype=jnp.bfloat16):
    """One-shot convenience wrapper. Prefer prepare_mlp_params + mlp_forward_padded
    so the weight padding/casting HBM pass isn't paid on every call."""
    params = prepare_mlp_params(w1, b1, w2, b2, param_dtype=param_dtype)
    return mlp_forward_padded(x, params, block_b=block_b, out_dtype=out_dtype)


# TODO(synk): MLP.accuracy (argmax + masked metric) is a host-side metric, not part
# of the forward pass, so it is intentionally not implemented as a kernel.


if __name__ == "__main__":
    # Shapes implied by the module's forward: input_dim=16, hidden_dim=32, out_dim=8.
    B, D_in, H, D_out = 8, 16, 32, 8

    key = jax.random.PRNGKey(0)
    (kx, kw1, kb1, kw2, kb2, kx2,
     kw1b, kb1b, kw2b, kb2b, kx3) = jax.random.split(key, 11)

    x = jax.random.normal(kx, (B, D_in), dtype=jnp.float32)
    # Deterministic synthetic parameters (nn.Linear-like init range).
    w1 = jax.random.uniform(kw1, (D_in, H), minval=-1.0, maxval=1.0) / jnp.sqrt(D_in)
    b1 = jax.random.uniform(kb1, (H,), minval=-1.0, maxval=1.0) / jnp.sqrt(D_in)
    w2 = jax.random.uniform(kw2, (H, D_out), minval=-1.0, maxval=1.0) / jnp.sqrt(H)
    b2 = jax.random.uniform(kb2, (D_out,), minval=-1.0, maxval=1.0) / jnp.sqrt(H)

    def ref_mlp(xv, a1, c1, a2, c2):
        return jax.nn.sigmoid(xv @ a1 + c1[None, :]) @ a2 + c2[None, :]

    # Pad/cast the parameters once (hoisted out of the per-call path).
    params = prepare_mlp_params(w1, b1, w2, b2)

    # 1) Small batch -> single-tile (no-grid) path.
    out = mlp_forward_padded(x, params)
    jax.block_until_ready(out)
    assert out.shape == (B, D_out)
    assert jnp.allclose(out, ref_mlp(x, w1, b1, w2, b2), atol=3e-2, rtol=3e-2), \
        "single-tile mismatch"

    # 2) Larger batch with a tiny block -> batch-tiled "parallel" path (3 tiles).
    B2 = 24
    x2 = jax.random.normal(kx2, (B2, D_in), dtype=jnp.float32)
    out2 = mlp_forward_padded(x2, params, block_b=8)
    jax.block_until_ready(out2)
    assert out2.shape == (B2, D_out)
    assert jnp.allclose(out2, ref_mlp(x2, w1, b1, w2, b2), atol=3e-2, rtol=3e-2), \
        "batch-tiled mismatch"

    # 3) Wider hidden layer with a forced hidden tile -> hidden-tiled accumulator
    #    path (grid = (batch_tiles, hidden_tiles), f32 scratch accumulation).
    H3, B3 = 256, 20
    w1b = jax.random.uniform(kw1b, (D_in, H3), minval=-1.0, maxval=1.0) / jnp.sqrt(D_in)
    b1b = jax.random.uniform(kb1b, (H3,), minval=-1.0, maxval=1.0) / jnp.sqrt(D_in)
    w2b = jax.random.uniform(kw2b, (H3, D_out), minval=-1.0, maxval=1.0) / jnp.sqrt(H3)
    b2b = jax.random.uniform(kb2b, (D_out,), minval=-1.0, maxval=1.0) / jnp.sqrt(H3)
    x3 = jax.random.normal(kx3, (B3, D_in), dtype=jnp.float32)
    params3 = prepare_mlp_params(w1b, b1b, w2b, b2b, block_h=128)
    out3 = mlp_forward_padded(x3, params3, block_b=8)
    jax.block_until_ready(out3)
    assert out3.shape == (B3, D_out)
    assert jnp.allclose(out3, ref_mlp(x3, w1b, b1b, w2b, b2b), atol=3e-2, rtol=3e-2), \
        "hidden-tiled mismatch"

    print("KERNEL_OK")
</pallas_src>

<mosaic_0001>
module attributes {stable_mosaic.version = 11 : i64} {
  func.func @_mlp_kernel(%arg0: memref<8x128xbf16, #tpu.memory_space<vmem>>, %arg1: memref<128x128xbf16, #tpu.memory_space<vmem>>, %arg2: memref<1x128xf32, #tpu.memory_space<vmem>>, %arg3: memref<128x128xbf16, #tpu.memory_space<vmem>>, %arg4: memref<1x128xf32, #tpu.memory_space<vmem>>, %arg5: memref<8x128xf32, #tpu.memory_space<vmem>>) attributes {dimension_semantics = [], scalar_prefetch = 0 : i64, scratch_operands = 0 : i64, tpu.core_type = #tpu.core_type<tc>} {
    %c0 = arith.constant 0 : index
    %c0_0 = arith.constant 0 : index
    %0 = vector.load %arg0[%c0, %c0_0] : memref<8x128xbf16, #tpu.memory_space<vmem>>, vector<8x128xbf16>
    %c0_1 = arith.constant 0 : index
    %c0_2 = arith.constant 0 : index
    %1 = vector.load %arg1[%c0_1, %c0_2] : memref<128x128xbf16, #tpu.memory_space<vmem>>, vector<128x128xbf16>
    %cst = arith.constant dense<0.000000e+00> : vector<8x128xf32>
    %2 = tpu.matmul %0, %1, %cst {dimension_numbers = #tpu.dot_dimension_numbers<[1], [0], [0], [1], [0, 0, 1, 1], [], []>} : vector<8x128xbf16>, vector<128x128xbf16>, vector<8x128xf32> -> vector<8x128xf32>
    %c0_3 = arith.constant 0 : index
    %c0_4 = arith.constant 0 : index
    %3 = vector.load %arg2[%c0_3, %c0_4] : memref<1x128xf32, #tpu.memory_space<vmem>>, vector<1x128xf32>
    %4 = vector.broadcast %3 : vector<1x128xf32> to vector<8x128xf32>
    %5 = arith.addf %2, %4 : vector<8x128xf32>
    %6 = arith.negf %5 : vector<8x128xf32>
    %7 = math.exp %6 : vector<8x128xf32>
    %cst_5 = arith.constant 1.000000e+00 : f32
    %8 = vector.broadcast %cst_5 : f32 to vector<8x128xf32>
    %9 = arith.addf %8, %7 : vector<8x128xf32>
    %10 = arith.divf %8, %9 : vector<8x128xf32>
    %11 = arith.truncf %10 : vector<8x128xf32> to vector<8x128xbf16>
    %c0_6 = arith.constant 0 : index
    %c0_7 = arith.constant 0 : index
    %12 = vector.load %arg3[%c0_6, %c0_7] : memref<128x128xbf16, #tpu.memory_space<vmem>>, vector<128x128xbf16>
    %cst_8 = arith.constant dense<0.000000e+00> : vector<8x128xf32>
    %13 = tpu.matmul %11, %12, %cst_8 {dimension_numbers = #tpu.dot_dimension_numbers<[1], [0], [0], [1], [0, 0, 1, 1], [], []>} : vector<8x128xbf16>, vector<128x128xbf16>, vector<8x128xf32> -> vector<8x128xf32>
    %c0_9 = arith.constant 0 : index
    %c0_10 = arith.constant 0 : index
    %14 = vector.load %arg4[%c0_9, %c0_10] : memref<1x128xf32, #tpu.memory_space<vmem>>, vector<1x128xf32>
    %15 = vector.broadcast %14 : vector<1x128xf32> to vector<8x128xf32>
    %16 = arith.addf %13, %15 : vector<8x128xf32>
    %c0_11 = arith.constant 0 : index
    %c0_12 = arith.constant 0 : index
    %17 = vector.load %arg5[%c0_11, %c0_12] : memref<8x128xf32, #tpu.memory_space<vmem>>, vector<8x128xf32>
    tpu.vector_store %arg5[%c0_11, %c0_12], %16 {strides = array<i32>} : memref<8x128xf32, #tpu.memory_space<vmem>>, vector<8x128xf32>,
    return
  }
}

module attributes {stable_mosaic.version = 11 : i64} {
  func.func @_mlp_kernel(%arg0: memref<8x128xbf16, #tpu.memory_space<vmem>>, %arg1: memref<128x128xbf16, #tpu.memory_space<vmem>>, %arg2: memref<1x128xf32, #tpu.memory_space<vmem>>, %arg3: memref<128x128xbf16, #tpu.memory_space<vmem>>, %arg4: memref<1x128xf32, #tpu.memory_space<vmem>>, %arg5: memref<8x128xf32, #tpu.memory_space<vmem>>) attributes {dimension_semantics = [], scalar_prefetch = 0 : i64, scratch_operands = 0 : i64, tpu.core_type = #tpu.core_type<tc>} {
    %c0 = arith.constant 0 : index
    %c0_0 = arith.constant 0 : index
    %0 = vector.load %arg0[%c0, %c0_0] : memref<8x128xbf16, #tpu.memory_space<vmem>>, vector<8x128xbf16>
    %c0_1 = arith.constant 0 : index
    %c0_2 = arith.constant 0 : index
    %1 = vector.load %arg1[%c0_1, %c0_2] : memref<128x128xbf16, #tpu.memory_space<vmem>>, vector<128x128xbf16>
    %cst = arith.constant dense<0.000000e+00> : vector<8x128xf32>
    %2 = tpu.matmul %0, %1, %cst {dimension_numbers = #tpu.dot_dimension_numbers<[1], [0], [0], [1], [0, 0, 1, 1], [], []>} : vector<8x128xbf16>, vector<128x128xbf16>, vector<8x128xf32> -> vector<8x128xf32>
    %c0_3 = arith.constant 0 : index
    %c0_4 = arith.constant 0 : index
    %3 = vector.load %arg2[%c0_3, %c0_4] : memref<1x128xf32, #tpu.memory_space<vmem>>, vector<1x128xf32>
    %4 = vector.broadcast %3 : vector<1x128xf32> to vector<8x128xf32>
    %5 = arith.addf %2, %4 : vector<8x128xf32>
    %6 = arith.negf %5 : vector<8x128xf32>
    %7 = math.exp %6 : vector<8x128xf32>
    %cst_5 = arith.constant 1.000000e+00 : f32
    %8 = vector.broadcast %cst_5 : f32 to vector<8x128xf32>
    %9 = arith.addf %8, %7 : vector<8x128xf32>
    %10 = arith.divf %8, %9 : vector<8x128xf32>
    %11 = arith.truncf %10 : vector<8x128xf32> to vector<8x128xbf16>
    %c0_6 = arith.constant 0 : index
    %c0_7 = arith.constant 0 : index
    %12 = vector.load %arg3[%c0_6, %c0_7] : memref<128x128xbf16, #tpu.memory_space<vmem>>, vector<128x128xbf16>
    %cst_8 = arith.constant dense<0.000000e+00> : vector<8x128xf32>
    %13 = tpu.matmul %11, %12, %cst_8 {dimension_numbers = #tpu.dot_dimension_numbers<[1], [0], [0], [1], [0, 0, 1, 1], [], []>} : vector<8x128xbf16>, vector<128x128xbf16>, vector<8x128xf32> -> vector<8x128xf32>
    %c0_9 = arith.constant 0 : index
    %c0_10 = arith.constant 0 : index
    %14 = vector.load %arg4[%c0_9, %c0_10] : memref<1x128xf32, #tpu.memory_space<vmem>>, vector<1x128xf32>
    %15 = vector.broadcast %14 : vector<1x128xf32> to vector<8x128xf32>
    %16 = arith.addf %13, %15 : vector<8x128xf32>
    %c0_11 = arith.constant 0 : index
    %c0_12 = arith.constant 0 : index
    %17 = vector.load %arg5[%c0_11, %c0_12] : memref<8x128xf32, #tpu.memory_space<vmem>>, vector<8x128xf32>
    tpu.vector_store %arg5[%c0_11, %c0_12], %16 {strides = array<i32>} : memref<8x128xf32, #tpu.memory_space<vmem>>, vector<8x128xf32>,
    return
  }
}

</mosaic_0001>

<bundles_post_ra>
// kernel: _mlp_forward_impl.1
= control target key start
LH: loop header
LB: loop body
LE: loop exit
PB: predicated region body
PF: predicated region fallthrough
CT: control target
= control target key end

     0   :  { %10 = vsyncpa [#allocation3], 0  ;;  %s555_s0 = inlined_call_operand.vmem [shape: bf16[8,128], index: 0, kind: input, shape index: {}]   ;;  %s556_s1 = inlined_call_operand.hbm [shape: bf16[128,128], index: 1, kind: input, shape index: {}]   ;;  %s557_s2 = inlined_call_operand.vmem [shape: f32[1,128], index: 2, kind: input, shape index: {}]   ;;  %s558_s3 = inlined_call_operand.hbm [shape: bf16[128,128], index: 3, kind: input, shape index: {}]   ;;  %s559_s4 = inlined_call_operand.vmem [shape: f32[1,128], index: 4, kind: input, shape index: {}]   ;;  %s560_s5 = inlined_call_operand.hbm [shape: f32[8,128], index: 5, kind: output, shape index: {}]  }
   0x1   :  { %11 = vsyncpa [#allocation6], 0 }
   0x2   :  { %12 = vsyncpa [#allocation4], 0  ;;  %s473_s18 = smov [#allocation2]   ;;  %s401_s22 = scalar_lea.hbm %s556_s1, 1024 }
   0x3   :  { %s20_s19 = sshll.u32 %s473_s18, 4  ;;  %p402_p0 = scmp.ne.s32.totalorder %s556_s1, %s401_s22  ;;  %s21_s19 = int_to_ptr.vmem [resolvable:$true] %s20_s19 }
   0x4   :  { %p405_p1 = scmp.lt.u32.totalorder %s401_s22, %s556_s1 }
   0x6   :  { %p407_p2 = pnand %p405_p1, %p402_p0 }
   0x8   :  { %410 = shalt.err (!%p407_p2)
}
   0x9   :  { %s411_s27 = scalar_lea.vmem %s21_s19, 1024  ;;  %p416_p4 = scmp.lt.s32.totalorder %s21_s19, %s21_s19 }
   0xa   :  { %p412_p3 = scmp.ne.s32.totalorder %s21_s19, %s411_s27  ;;  %p417_p5 = scmp.lt.s32.totalorder %s411_s27, %s411_s27 }
   0xc   :  { %p418_p6 = por %p417_p5, %p416_p4 }
   0xe   :  { %p419_p7 = pnand %p418_p6, %p412_p3 }
  0x10   :  { %422 = shalt.err (!%p419_p7)
}
  0x11   :  { %s474_s28 = smov 64   ;;  %s475_s29 = smov 4  }
  0x12   :  { %26 = dma.hbm_to_vmem [thread:$0]  %s556_s1, 1024, %s21_s19, [#allocation3], %s474_s28, %s474_s28, %s475_s29  }
  0x13   :  { %s476_s7 = smov [#allocation5]   ;;  %s423_s11 = scalar_lea.hbm %s558_s3, 1024 }
  0x14   :  { %s34_s8 = sshll.u32 %s476_s7, 4  ;;  %p424_p8 = scmp.ne.s32.totalorder %s558_s3, %s423_s11  ;;  %s35_s8 = int_to_ptr.vmem [resolvable:$true] %s34_s8 }
  0x15   :  { %p427_p9 = scmp.lt.u32.totalorder %s423_s11, %s558_s3 }
  0x17   :  { %p429_p10 = pnand %p427_p9, %p424_p8 }
  0x19   :  { %432 = shalt.err (!%p429_p10)
}
  0x1a   :  { %s433_s16 = scalar_lea.vmem %s35_s8, 1024  ;;  %p438_p12 = scmp.lt.s32.totalorder %s35_s8, %s35_s8 }
  0x1b   :  { %p434_p11 = scmp.ne.s32.totalorder %s35_s8, %s433_s16  ;;  %p439_p13 = scmp.lt.s32.totalorder %s433_s16, %s433_s16 }
  0x1d   :  { %p440_p0 = por %p439_p13, %p438_p12 }
  0x1f   :  { %p441_p1 = pnand %p440_p0, %p434_p11 }
  0x21   :  { %444 = shalt.err (!%p441_p1)
}
  0x22   :  { %40 = dma.hbm_to_vmem [thread:$0]  %s558_s3, 1024, %s35_s8, [#allocation6], %s474_s28, %s474_s28, %s475_s29  }
  0x23   :  { %467 = dma.done.wait [#allocation3], 1024  }
  0x24   :  { %468 = vsyncadd [#allocation3], 4294966272 }
  0x25   :  { %469 = dma.done.wait [#allocation6], 1024  }
  0x26   :  { %470 = vsyncadd [#allocation6], 4294966272  ;;  %v477_v0 = vmov 0.0   ;;  %vm478_vm0 = vmmov 0   ;;  %v381_v1 = vld [vmem:[#allocation2] sm:$0xff]   ;;  %v382_v2 = vld [vmem:[#allocation2 + $0x8] sm:$0xff]  }
  0x27   :  { %334 = vmatprep.subr.bf16.mxu0 %v477_v0  ;;  %350 = vmatprep.mubr.msk.bf16.mxu0 %vm478_vm0, %v477_v0  ;;  %v383_v3 = vld [vmem:[#allocation2 + $0x10] sm:$0xff]   ;;  %v384_v4 = vld [vmem:[#allocation2 + $0x18] sm:$0xff]   ;;  %v385_v5 = vld [vmem:[#allocation2 + $0x20] sm:$0xff]   ;;  %s479_s22 = smov [#allocation7]  }
  0x28   :  { %354 = vmatprep.subr.bf16.mxu1 %v477_v0  ;;  %370 = vmatprep.mubr.msk.bf16.mxu1 %vm478_vm0, %v477_v0  ;;  %v386_v6 = vld [vmem:[#allocation2 + $0x28] sm:$0xff]   ;;  %v387_v7 = vld [vmem:[#allocation2 + $0x30] sm:$0xff]   ;;  %v388_v8 = vld [vmem:[#allocation2 + $0x38] sm:$0xff]   ;;  %s287_s23 = sshll.u32 %s479_s22, 4  ;;  %s288_s23 = int_to_ptr.vmem [resolvable:$true] %s287_s23 }
  0x29   :  { %335 = vmatpush3.bf16.msra.mxu0 %v381_v1  ;;  %v50_v9 = vld [vmem:[%s555_s0] sm:$0xf]  ;;  %v390_v11 = vld [vmem:[#allocation5 + $0x8] sm:$0xff]   ;;  %v391_v12 = vld [vmem:[#allocation5 + $0x10] sm:$0xff]   ;;  %p450_p3 = scmp.lt.s32.totalorder %s288_s23, %s288_s23 }
  0x2a   :  { %336 = vmatprep.subr.bf16.mxu0 %v477_v0  ;;  %v389_v10 = vld [vmem:[#allocation5] sm:$0xff]   ;;  %v392_v13 = vld [vmem:[#allocation5 + $0x18] sm:$0xff]   ;;  %v394_v15 = vld [vmem:[#allocation5 + $0x28] sm:$0xff]  }
  0x2b   :  { %355 = vmatpush3.bf16.msra.mxu1 %v389_v10  ;;  %v393_v14 = vld [vmem:[#allocation5 + $0x20] sm:$0xff]   ;;  %v395_v16 = vld [vmem:[#allocation5 + $0x30] sm:$0xff]   ;;  %v396_v17 = vld [vmem:[#allocation5 + $0x38] sm:$0xff]  }
  0x2c   :  { %356 = vmatprep.subr.bf16.mxu1 %v477_v0  ;;  %v297_v18 = vld [vmem:[%s557_s2] ss:$0 sm:$0xff]  ;;  %s445_s2 = scalar_lea.vmem %s288_s23, 128 }
  0x2d   :  { %337 = vmatpush3.bf16.msra.mxu0 %v382_v2  ;;  %v307_v29 = vld [vmem:[%s559_s4] ss:$0 sm:$0xff]  ;;  %p446_p2 = scmp.ne.s32.totalorder %s288_s23, %s445_s2  ;;  %p451_p4 = scmp.lt.s32.totalorder %s445_s2, %s445_s2 }
  0x2e   :  { %338 = vmatprep.subr.bf16.mxu0 %v477_v0 }
  0x2f   :  { %357 = vmatpush3.bf16.msra.mxu1 %v390_v11  ;;  %p452_p5 = por %p451_p4, %p450_p3 }
  0x30   :  { %358 = vmatprep.subr.bf16.mxu1 %v477_v0 }
  0x31   :  { %339 = vmatpush3.bf16.msra.mxu0 %v383_v3  ;;  %p453_p6 = pnand %p452_p5, %p446_p2 }
  0x32   :  { %340 = vmatprep.subr.bf16.mxu0 %v477_v0 }
  0x33   :  { %359 = vmatpush3.bf16.msra.mxu1 %v391_v12 }
  0x34   :  { %360 = vmatprep.subr.bf16.mxu1 %v477_v0 }
  0x35   :  { %341 = vmatpush3.bf16.msra.mxu0 %v384_v4 }
  0x36   :  { %342 = vmatprep.subr.bf16.mxu0 %v477_v0 }
  0x37   :  { %361 = vmatpush3.bf16.msra.mxu1 %v392_v13 }
  0x38   :  { %362 = vmatprep.subr.bf16.mxu1 %v477_v0 }
  0x39   :  { %343 = vmatpush3.bf16.msra.mxu0 %v385_v5 }
  0x3a   :  { %344 = vmatprep.subr.bf16.mxu0 %v477_v0 }
  0x3b   :  { %363 = vmatpush3.bf16.msra.mxu1 %v393_v14 }
  0x3c   :  { %364 = vmatprep.subr.bf16.mxu1 %v477_v0 }
  0x3d   :  { %345 = vmatpush3.bf16.msra.mxu0 %v386_v6 }
  0x3e   :  { %346 = vmatprep.subr.bf16.mxu0 %v477_v0 }
  0x3f   :  { %365 = vmatpush3.bf16.msra.mxu1 %v394_v15 }
  0x40   :  { %366 = vmatprep.subr.bf16.mxu1 %v477_v0 }
  0x41   :  { %347 = vmatpush3.bf16.msra.mxu0 %v387_v7 }
  0x42   :  { %348 = vmatprep.subr.bf16.mxu0 %v477_v0 }
  0x43   :  { %367 = vmatpush3.bf16.msra.mxu1 %v395_v16 }
  0x44   :  { %368 = vmatprep.subr.bf16.mxu1 %v477_v0 }
  0x45   :  { %349 = vmatpush3.bf16.msra.mxu0 %v388_v8 }
  0x47   :  { %369 = vmatpush3.bf16.msra.mxu1 %v396_v17 }
  0x48   :  { %351 = vmatmul.mubr.bf16.vlgmr.msra.gmra.mrb[0].mxu0 %v50_v9 }
 0x11b   :  { %v156_v19 = vpop.f32.mrb[0].mxu0 }
 0x11c   :  { %v157_v20 = vadd.f32 %v297_v18, %v156_v19  ;;  %v352_v21 = vpop.f32.mrb[1].mxu0 }
 0x11d   :  { %v159_v22 = vpop.f32.mrb[2].mxu0 }
 0x11e   :  { %v306_v23 = vmul.f32 -1.442695, %v157_v20  ;;  %v353_v24 = vpop.f32.mrb[3].mxu0 }
 0x120   :  { %397 = vpow2.f32 %v306_v23 }
 0x12a   :  { %v398_v25 = vpop.eup %397 }
 0x12b   :  { %v165_v26 = vadd.f32 1.0, %v398_v25 }
 0x12d   :  { %399 = vrcp.f32 %v165_v26 }
 0x137   :  { %v400_v27 = vpop.eup %399 }
 0x138   :  { %v168_v28 = vpack.c.bf16 %v400_v27, %v400_v27 }
 0x13a   :  { %371 = vmatmul.mubr.bf16.vlgmr.msra.gmra.mrb[0].mxu1 %v168_v28 }
 0x20d   :  { %v274_v30 = vpop.f32.mrb[0].mxu1 }
 0x20e   :  { %v275_v31 = vadd.f32 %v307_v29, %v274_v30  ;;  %v372_v32 = vpop.f32.mrb[1].mxu1 }
 0x20f   :  { %v277_v33 = vpop.f32.mrb[2].mxu1 }
 0x210   :  { %280 = vst [vmem:[#allocation7] sm:$0xff] %v275_v31  ;;  %v373_v34 = vpop.f32.mrb[3].mxu1 }
 0x211   :  { %456 = shalt.err (!%p453_p6)
}
 0x212   :  { %s457_s4 = scalar_lea.hbm %s560_s5, 128 }
 0x213   :  { %p458_p7 = scmp.ne.s32.totalorder %s560_s5, %s457_s4  ;;  %p461_p8 = scmp.lt.u32.totalorder %s457_s4, %s560_s5 }
 0x215   :  { %p463_p9 = pnand %p461_p8, %p458_p7 }
 0x217   :  { %466 = shalt.err (!%p463_p9)
}
 0x218   :  { %290 = dma.vmem_to_hbm [thread:$0]  %s288_s23, 128, %s560_s5, [#allocation4]  }
 0x219   :  { %471 = dma.done.wait [#allocation4], 128  }
 0x21a   :  { %472 = vsyncadd [#allocation4], 4294967168 }
 0x21b   :  { %294 = vsyncpa [#allocation3], 1 }
 0x21c   :  { %295 = vsyncpa [#allocation6], 1 }
 0x21d   :  { %296 = vsyncpa [#allocation4], 1 }

// kernel: _mlp_forward_impl.1
= control target key start
LH: loop header
LB: loop body
LE: loop exit
PB: predicated region body
PF: predicated region fallthrough
CT: control target
= control target key end

     0   :  { %10 = vsyncpa [#allocation3], 0  ;;  %s555_s0 = inlined_call_operand.vmem [shape: bf16[8,128], index: 0, kind: input, shape index: {}]   ;;  %s556_s1 = inlined_call_operand.hbm [shape: bf16[128,128], index: 1, kind: input, shape index: {}]   ;;  %s557_s2 = inlined_call_operand.vmem [shape: f32[1,128], index: 2, kind: input, shape index: {}]   ;;  %s558_s3 = inlined_call_operand.hbm [shape: bf16[128,128], index: 3, kind: input, shape index: {}]   ;;  %s559_s4 = inlined_call_operand.vmem [shape: f32[1,128], index: 4, kind: input, shape index: {}]   ;;  %s560_s5 = inlined_call_operand.hbm [shape: f32[8,128], index: 5, kind: output, shape index: {}]  }
   0x1   :  { %11 = vsyncpa [#allocation6], 0 }
   0x2   :  { %12 = vsyncpa [#allocation4], 0  ;;  %s473_s18 = smov [#allocation2]   ;;  %s401_s22 = scalar_lea.hbm %s556_s1, 1024 }
   0x3   :  { %s20_s19 = sshll.u32 %s473_s18, 4  ;;  %p402_p0 = scmp.ne.s32.totalorder %s556_s1, %s401_s22  ;;  %s21_s19 = int_to_ptr.vmem [resolvable:$true] %s20_s19 }
   0x4   :  { %p405_p1 = scmp.lt.u32.totalorder %s401_s22, %s556_s1 }
   0x6   :  { %p407_p2 = pnand %p405_p1, %p402_p0 }
   0x8   :  { %410 = shalt.err (!%p407_p2)
}
   0x9   :  { %s411_s27 = scalar_lea.vmem %s21_s19, 1024  ;;  %p416_p4 = scmp.lt.s32.totalorder %s21_s19, %s21_s19 }
   0xa   :  { %p412_p3 = scmp.ne.s32.totalorder %s21_s19, %s411_s27  ;;  %p417_p5 = scmp.lt.s32.totalorder %s411_s27, %s411_s27 }
   0xc   :  { %p418_p6 = por %p417_p5, %p416_p4 }
   0xe   :  { %p419_p7 = pnand %p418_p6, %p412_p3 }
  0x10   :  { %422 = shalt.err (!%p419_p7)
}
  0x11   :  { %s474_s28 = smov 64   ;;  %s475_s29 = smov 4  }
  0x12   :  { %26 = dma.hbm_to_vmem [thread:$0]  %s556_s1, 1024, %s21_s19, [#allocation3], %s474_s28, %s474_s28, %s475_s29  }
  0x13   :  { %s476_s7 = smov [#allocation5]   ;;  %s423_s11 = scalar_lea.hbm %s558_s3, 1024 }
  0x14   :  { %s34_s8 = sshll.u32 %s476_s7, 4  ;;  %p424_p8 = scmp.ne.s32.totalorder %s558_s3, %s423_s11  ;;  %s35_s8 = int_to_ptr.vmem [resolvable:$true] %s34_s8 }
  0x15   :  { %p427_p9 = scmp.lt.u32.totalorder %s423_s11, %s558_s3 }
  0x17   :  { %p429_p10 = pnand %p427_p9, %p424_p8 }
  0x19   :  { %432 = shalt.err (!%p429_p10)
}
  0x1a   :  { %s433_s16 = scalar_lea.vmem %s35_s8, 1024  ;;  %p438_p12 = scmp.lt.s32.totalorder %s35_s8, %s35_s8 }
  0x1b   :  { %p434_p11 = scmp.ne.s32.totalorder %s35_s8, %s433_s16  ;;  %p439_p13 = scmp.lt.s32.totalorder %s433_s16, %s433_s16 }
  0x1d   :  { %p440_p0 = por %p439_p13, %p438_p12 }
  0x1f   :  { %p441_p1 = pnand %p440_p0, %p434_p11 }
  0x21   :  { %444 = shalt.err (!%p441_p1)
}
  0x22   :  { %40 = dma.hbm_to_vmem [thread:$0]  %s558_s3, 1024, %s35_s8, [#allocation6], %s474_s28, %s474_s28, %s475_s29  }
  0x23   :  { %467 = dma.done.wait [#allocation3], 1024  }
  0x24   :  { %468 = vsyncadd [#allocation3], 4294966272 }
  0x25   :  { %469 = dma.done.wait [#allocation6], 1024  }
  0x26   :  { %470 = vsyncadd [#allocation6], 4294966272  ;;  %v477_v0 = vmov 0.0   ;;  %vm478_vm0 = vmmov 0   ;;  %v381_v1 = vld [vmem:[#allocation2] sm:$0xff]   ;;  %v382_v2 = vld [vmem:[#allocation2 + $0x8] sm:$0xff]  }
  0x27   :  { %334 = vmatprep.subr.bf16.mxu0 %v477_v0  ;;  %350 = vmatprep.mubr.msk.bf16.mxu0 %vm478_vm0, %v477_v0  ;;  %v383_v3 = vld [vmem:[#allocation2 + $0x10] sm:$0xff]   ;;  %v384_v4 = vld [vmem:[#allocation2 + $0x18] sm:$0xff]   ;;  %v385_v5 = vld [vmem:[#allocation2 + $0x20] sm:$0xff]   ;;  %s479_s22 = smov [#allocation7]  }
  0x28   :  { %354 = vmatprep.subr.bf16.mxu1 %v477_v0  ;;  %370 = vmatprep.mubr.msk.bf16.mxu1 %vm478_vm0, %v477_v0  ;;  %v386_v6 = vld [vmem:[#allocation2 + $0x28] sm:$0xff]   ;;  %v387_v7 = vld [vmem:[#allocation2 + $0x30] sm:$0xff]   ;;  %v388_v8 = vld [vmem:[#allocation2 + $0x38] sm:$0xff]   ;;  %s287_s23 = sshll.u32 %s479_s22, 4  ;;  %s288_s23 = int_to_ptr.vmem [resolvable:$true] %s287_s23 }
  0x29   :  { %335 = vmatpush3.bf16.msra.mxu0 %v381_v1  ;;  %v50_v9 = vld [vmem:[%s555_s0] sm:$0xf]  ;;  %v390_v11 = vld [vmem:[#allocation5 + $0x8] sm:$0xff]   ;;  %v391_v12 = vld [vmem:[#allocation5 + $0x10] sm:$0xff]   ;;  %p450_p3 = scmp.lt.s32.totalorder %s288_s23, %s288_s23 }
  0x2a   :  { %336 = vmatprep.subr.bf16.mxu0 %v477_v0  ;;  %v389_v10 = vld [vmem:[#allocation5] sm:$0xff]   ;;  %v392_v13 = vld [vmem:[#allocation5 + $0x18] sm:$0xff]   ;;  %v394_v15 = vld [vmem:[#allocation5 + $0x28] sm:$0xff]  }
  0x2b   :  { %355 = vmatpush3.bf16.msra.mxu1 %v389_v10  ;;  %v393_v14 = vld [vmem:[#allocation5 + $0x20] sm:$0xff]   ;;  %v395_v16 = vld [vmem:[#allocation5 + $0x30] sm:$0xff]   ;;  %v396_v17 = vld [vmem:[#allocation5 + $0x38] sm:$0xff]  }
  0x2c   :  { %356 = vmatprep.subr.bf16.mxu1 %v477_v0  ;;  %v297_v18 = vld [vmem:[%s557_s2] ss:$0 sm:$0xff]  ;;  %s445_s2 = scalar_lea.vmem %s288_s23, 128 }
  0x2d   :  { %337 = vmatpush3.bf16.msra.mxu0 %v382_v2  ;;  %v307_v29 = vld [vmem:[%s559_s4] ss:$0 sm:$0xff]  ;;  %p446_p2 = scmp.ne.s32.totalorder %s288_s23, %s445_s2  ;;  %p451_p4 = scmp.lt.s32.totalorder %s445_s2, %s445_s2 }
  0x2e   :  { %338 = vmatprep.subr.bf16.mxu0 %v477_v0 }
  0x2f   :  { %357 = vmatpush3.bf16.msra.mxu1 %v390_v11  ;;  %p452_p5 = por %p451_p4, %p450_p3 }
  0x30   :  { %358 = vmatprep.subr.bf16.mxu1 %v477_v0 }
  0x31   :  { %339 = vmatpush3.bf16.msra.mxu0 %v383_v3  ;;  %p453_p6 = pnand %p452_p5, %p446_p2 }
  0x32   :  { %340 = vmatprep.subr.bf16.mxu0 %v477_v0 }
  0x33   :  { %359 = vmatpush3.bf16.msra.mxu1 %v391_v12 }
  0x34   :  { %360 = vmatprep.subr.bf16.mxu1 %v477_v0 }
  0x35   :  { %341 = vmatpush3.bf16.msra.mxu0 %v384_v4 }
  0x36   :  { %342 = vmatprep.subr.bf16.mxu0 %v477_v0 }
  0x37   :  { %361 = vmatpush3.bf16.msra.mxu1 %v392_v13 }
  0x38   :  { %362 = vmatprep.subr.bf16.mxu1 %v477_v0 }
  0x39   :  { %343 = vmatpush3.bf16.msra.mxu0 %v385_v5 }
  0x3a   :  { %344 = vmatprep.subr.bf16.mxu0 %v477_v0 }
  0x3b   :  { %363 = vmatpush3.bf16.msra.mxu1 %v393_v14 }
  0x3c   :  { %364 = vmatprep.subr.bf16.mxu1 %v477_v0 }
  0x3d   :  { %345 = vmatpush3.bf16.msra.mxu0 %v386_v6 }
  0x3e   :  { %346 = vmatprep.subr.bf16.mxu0 %v477_v0 }
  0x3f   :  { %365 = vmatpush3.bf16.msra.mxu1 %v394_v15 }
  0x40   :  { %366 = vmatprep.subr.bf16.mxu1 %v477_v0 }
  0x41   :  { %347 = vmatpush3.bf16.msra.mxu0 %v387_v7 }
  0x42   :  { %348 = vmatprep.subr.bf16.mxu0 %v477_v0 }
  0x43   :  { %367 = vmatpush3.bf16.msra.mxu1 %v395_v16 }
  0x44   :  { %368 = vmatprep.subr.bf16.mxu1 %v477_v0 }
  0x45   :  { %349 = vmatpush3.bf16.msra.mxu0 %v388_v8 }
  0x47   :  { %369 = vmatpush3.bf16.msra.mxu1 %v396_v17 }
  0x48   :  { %351 = vmatmul.mubr.bf16.vlgmr.msra.gmra.mrb[0].mxu0 %v50_v9 }
 0x11b   :  { %v156_v19 = vpop.f32.mrb[0].mxu0 }
 0x11c   :  { %v157_v20 = vadd.f32 %v297_v18, %v156_v19  ;;  %v352_v21 = vpop.f32.mrb[1].mxu0 }
 0x11d   :  { %v159_v22 = vpop.f32.mrb[2].mxu0 }
 0x11e   :  { %v306_v23 = vmul.f32 -1.442695, %v157_v20  ;;  %v353_v24 = vpop.f32.mrb[3].mxu0 }
 0x120   :  { %397 = vpow2.f32 %v306_v23 }
 0x12a   :  { %v398_v25 = vpop.eup %397 }
 0x12b   :  { %v165_v26 = vadd.f32 1.0, %v398_v25 }
 0x12d   :  { %399 = vrcp.f32 %v165_v26 }
 0x137   :  { %v400_v27 = vpop.eup %399 }
 0x138   :  { %v168_v28 = vpack.c.bf16 %v400_v27, %v400_v27 }
 0x13a   :  { %371 = vmatmul.mubr.bf16.vlgmr.msra.gmra.mrb[0].mxu1 %v168_v28 }
 0x20d   :  { %v274_v30 = vpop.f32.mrb[0].mxu1 }
 0x20e   :  { %v275_v31 = vadd.f32 %v307_v29, %v274_v30  ;;  %v372_v32 = vpop.f32.mrb[1].mxu1 }
 0x20f   :  { %v277_v33 = vpop.f32.mrb[2].mxu1 }
 0x210   :  { %280 = vst [vmem:[#allocation7] sm:$0xff] %v275_v31  ;;  %v373_v34 = vpop.f32.mrb[3].mxu1 }
 0x211   :  { %456 = shalt.err (!%p453_p6)
}
 0x212   :  { %s457_s4 = scalar_lea.hbm %s560_s5, 128 }
 0x213   :  { %p458_p7 = scmp.ne.s32.totalorder %s560_s5, %s457_s4  ;;  %p461_p8 = scmp.lt.u32.totalorder %s457_s4, %s560_s5 }
 0x215   :  { %p463_p9 = pnand %p461_p8, %p458_p7 }
 0x217   :  { %466 = shalt.err (!%p463_p9)
}
 0x218   :  { %290 = dma.vmem_to_hbm [thread:$0]  %s288_s23, 128, %s560_s5, [#allocation4]  }
 0x219   :  { %471 = dma.done.wait [#allocation4], 128  }
 0x21a   :  { %472 = vsyncadd [#allocation4], 4294967168 }
 0x21b   :  { %294 = vsyncpa [#allocation3], 1 }
 0x21c   :  { %295 = vsyncpa [#allocation6], 1 }
 0x21d   :  { %296 = vsyncpa [#allocation4], 1 }

</bundles_post_ra>
